<compile_context>
chip_gen: v6e
topology: v6e:2x2x1
jax: 0.10.0
libtpu: 0.0.40
codegen_flags: <defaults>
</compile_context>

<pallas_src>
from functools import partial

import jax
import jax.numpy as jnp
from jax.experimental import pallas as pl
from jax.experimental.pallas import tpu as pltpu

BN_EPS = 1e-5

_LANE = 128
# Double-buffered (in + out) streaming footprint allowed for the gating
# kernel: conservative for v5e's 16 MiB scoped-VMEM default and for a v7x
# TensorCore's 64 MiB physical / 32 MiB scoped VMEM.
_TILE_VMEM_BUDGET = 8 * 1024 * 1024


def _choose_l_tile(L, rows, in_bytes, out_bytes):
    """Lane-tile size for the gating kernel.

    Rules: multiple of 128 lanes (unmasked vst) unless L itself is <= 128;
    double-buffered in+out footprint within _TILE_VMEM_BUDGET; aim for >= 4
    grid steps so BlockSpec pipelining overlaps DMA with compute and both
    v7x TensorCores get 'parallel' work.
    """
    if L <= _LANE:
        return L                                          # one full-extent block
    per_lane = 2 * rows * (in_bytes + out_bytes)          # double-buffered bytes/lane
    cap = max(_LANE, (_TILE_VMEM_BUDGET // per_lane) // _LANE * _LANE)
    target = max(_LANE, ((pl.cdiv(L, 4) + _LANE - 1) // _LANE) * _LANE)
    return min(cap, target, 2048)


def _gating_kernel(t1_ref, t2_ref, v_ref, o_ref):
    """o = sigmoid(tanh(v * t1) + t2) on a lane-dense (B*Vd, tl) tile.

    t1/t2: (B*Vd, 1) f32 columns, resident across the grid (index_map pins
    block (0,0)), broadcast along lanes -- a per-sublane lane-splat, no XLU
    relayout in the steady state.  v/o may be bf16 (streaming mode); the math
    is always f32 and both transcendentals stay on the EUP slot.
    """
    v = v_ref[...].astype(jnp.float32)
    z = jnp.tanh(v * t1_ref[...]) + t2_ref[...]
    # sigmoid(z) == 0.5 * tanh(0.5 * z) + 0.5   (EUP, no VPU divide)
    o_ref[...] = (0.5 * jnp.tanh(0.5 * z) + 0.5).astype(o_ref.dtype)


@partial(jax.jit, static_argnames=("stream_bf16",))
def metablock_forward(v, u, params, *, stream_bf16=False):
    """v: (B, Vd, L) float32, u: (B, Ud) float32 -> (B, Vd, L)."""
    B, Vd, L = v.shape
    rows = B * Vd

    # ---- Stage 1: fused f|g Linear + BatchNorm1d (training-mode batch stats).
    # ~2*B*Ud*2*Vd FLOPs: left to XLA inside this same jitted executable
    # (no extra pallas_call dispatch, no HBM round trip worth speaking of,
    # no in-kernel cross-lane reshape of the tiny t tensor).
    t = jnp.dot(u, params["w"]) + params["b"]                    # (B, 2Vd)
    mean = jnp.mean(t, axis=0, keepdims=True)
    var = jnp.mean(jnp.square(t - mean), axis=0, keepdims=True)  # biased
    t = params["gamma"] * (t - mean) / jnp.sqrt(var + BN_EPS) + params["beta"]

    # Gate scalars with Vd on the sublane axis, matching V's flattened layout.
    t1 = t[:, :Vd].reshape(rows, 1)
    t2 = t[:, Vd:].reshape(rows, 1)

    # ---- Stage 2: memory-bound gating kernel over L, flattened lane-dense 2-D.
    stream_dtype = jnp.bfloat16 if stream_bf16 else jnp.float32
    elem_bytes = jnp.dtype(stream_dtype).itemsize
    v2 = v.reshape(rows, L).astype(stream_dtype)                 # contiguous reshape

    tl = _choose_l_tile(L, rows, elem_bytes, elem_bytes)
    grid = (pl.cdiv(L, tl),)

    footprint = 2 * rows * tl * 2 * elem_bytes + 4 * rows * 4    # dbl-buffered v/o + t1/t2
    vmem_limit = int(min(64 * 2**20, max(2 * footprint, 4 * 2**20)))

    out2 = pl.pallas_call(
        _gating_kernel,
        out_shape=jax.ShapeDtypeStruct((rows, L), stream_dtype),
        grid=grid,
        in_specs=[
            pl.BlockSpec((rows, 1), lambda l: (0, 0)),    # t1 (resident)
            pl.BlockSpec((rows, 1), lambda l: (0, 0)),    # t2 (resident)
            pl.BlockSpec((rows, tl), lambda l: (0, l)),   # V tile
        ],
        out_specs=pl.BlockSpec((rows, tl), lambda l: (0, l)),
        compiler_params=pltpu.CompilerParams(
            dimension_semantics=("parallel",),
            vmem_limit_bytes=vmem_limit,
        ),
    )(t1, t2, v2)

    return out2.reshape(B, Vd, L)


def init_params(key, u_dim, v_dim):
    """PyTorch-style init: Linear U(-1/sqrt(U), 1/sqrt(U)); BN weight=1, bias=0.

    The f and g branches are fused once here along the feature axis, so the
    forward never concatenates per call.  Weights are stored (Ud, 2Vd) so the
    forward computes u @ W directly.
    """
    kf_w, kf_b, kg_w, kg_b = jax.random.split(key, 4)
    bound = 1.0 / jnp.sqrt(jnp.float32(u_dim))
    wf = jax.random.uniform(kf_w, (u_dim, v_dim), jnp.float32, -bound, bound)
    bf = jax.random.uniform(kf_b, (1, v_dim), jnp.float32, -bound, bound)
    wg = jax.random.uniform(kg_w, (u_dim, v_dim), jnp.float32, -bound, bound)
    bg = jax.random.uniform(kg_b, (1, v_dim), jnp.float32, -bound, bound)
    return dict(
        w=jnp.concatenate([wf, wg], axis=1),        # (Ud, 2Vd)
        b=jnp.concatenate([bf, bg], axis=1),        # (1, 2Vd)
        gamma=jnp.ones((1, 2 * v_dim), jnp.float32),
        beta=jnp.zeros((1, 2 * v_dim), jnp.float32),
    )


def metablock_reference(v, u, params):
    """Pure-JAX reference matching the PyTorch forward (training-mode BN)."""
    Vd = v.shape[1]
    t = u @ params["w"] + params["b"]
    mean = jnp.mean(t, axis=0, keepdims=True)
    var = jnp.mean((t - mean) ** 2, axis=0, keepdims=True)
    t = params["gamma"] * (t - mean) / jnp.sqrt(var + BN_EPS) + params["beta"]
    t1, t2 = t[:, :Vd], t[:, Vd:]
    return jax.nn.sigmoid(jnp.tanh(v * t1[:, :, None]) + t2[:, :, None])


if __name__ == "__main__":
    B, V_DIM, U_DIM, L = 4, 16, 8, 256

    key = jax.random.PRNGKey(0)
    k_v, k_u, k_p = jax.random.split(key, 3)
    v_in = jax.random.normal(k_v, (B, V_DIM, L), jnp.float32)
    u_in = jax.random.normal(k_u, (B, U_DIM), jnp.float32)
    params = init_params(k_p, U_DIM, V_DIM)

    # Bit-faithful f32 path.
    out = jax.block_until_ready(metablock_forward(v_in, u_in, params))
    ref = jax.block_until_ready(metablock_reference(v_in, u_in, params))
    assert out.shape == (B, V_DIM, L)
    assert jnp.allclose(out, ref, atol=1e-5, rtol=1e-5), "f32 mismatch vs reference"

    # bf16 streaming path (HBM-bandwidth optimization); looser tolerance.
    out_bf16 = jax.block_until_ready(
        metablock_forward(v_in, u_in, params, stream_bf16=True))
    assert out_bf16.shape == (B, V_DIM, L)
    assert jnp.allclose(out_bf16.astype(jnp.float32), ref, atol=2e-2, rtol=2e-2), \
        "bf16 mismatch vs reference"

    print("KERNEL_OK")
</pallas_src>

<mosaic_0001>
module attributes {stable_mosaic.version = 11 : i64} {
  func.func @_gating_kernel(%arg0: i32, %arg1: memref<64x1xf32, #tpu.memory_space<vmem>>, %arg2: memref<64x1xf32, #tpu.memory_space<vmem>>, %arg3: memref<64x128xf32, #tpu.memory_space<vmem>>, %arg4: memref<64x128xf32, #tpu.memory_space<vmem>>) attributes {dimension_semantics = [#tpu.dimension_semantics<parallel>], iteration_bounds = array<i64: 2>, scalar_prefetch = 0 : i64, scratch_operands = 0 : i64, tpu.core_type = #tpu.core_type<tc>, window_params = [{pipeline_mode = #tpu.pipeline_mode<synchronous>, transform_indices = @transform_0, window_bounds = array<i64: 64, 1>}, {pipeline_mode = #tpu.pipeline_mode<synchronous>, transform_indices = @transform_1, window_bounds = array<i64: 64, 1>}, {transform_indices = @transform_2, window_bounds = array<i64: 64, 128>}, {transform_indices = @transform_3, window_bounds = array<i64: 64, 128>}]} {
    %c0 = arith.constant 0 : index
    %c0_0 = arith.constant 0 : index
    %0 = vector.load %arg3[%c0, %c0_0] : memref<64x128xf32, #tpu.memory_space<vmem>>, vector<64x128xf32>
    %c0_1 = arith.constant 0 : index
    %c0_2 = arith.constant 0 : index
    %1 = vector.load %arg1[%c0_1, %c0_2] : memref<64x1xf32, #tpu.memory_space<vmem>>, vector<64x1xf32>
    %2 = vector.broadcast %1 : vector<64x1xf32> to vector<64x128xf32>
    %3 = arith.mulf %0, %2 : vector<64x128xf32>
    %4 = math.tanh %3 : vector<64x128xf32>
    %c0_3 = arith.constant 0 : index
    %c0_4 = arith.constant 0 : index
    %5 = vector.load %arg2[%c0_3, %c0_4] : memref<64x1xf32, #tpu.memory_space<vmem>>, vector<64x1xf32>
    %6 = vector.broadcast %5 : vector<64x1xf32> to vector<64x128xf32>
    %7 = arith.addf %4, %6 : vector<64x128xf32>
    %cst = arith.constant 5.000000e-01 : f32
    %8 = vector.broadcast %cst : f32 to vector<64x128xf32>
    %9 = arith.mulf %8, %7 : vector<64x128xf32>
    %10 = math.tanh %9 : vector<64x128xf32>
    %cst_5 = arith.constant 5.000000e-01 : f32
    %11 = vector.broadcast %cst_5 : f32 to vector<64x128xf32>
    %12 = arith.mulf %11, %10 : vector<64x128xf32>
    %cst_6 = arith.constant 5.000000e-01 : f32
    %13 = vector.broadcast %cst_6 : f32 to vector<64x128xf32>
    %14 = arith.addf %12, %13 : vector<64x128xf32>
    %c0_7 = arith.constant 0 : index
    %c0_8 = arith.constant 0 : index
    %15 = vector.load %arg4[%c0_7, %c0_8] : memref<64x128xf32, #tpu.memory_space<vmem>>, vector<64x128xf32>
    tpu.vector_store %arg4[%c0_7, %c0_8], %14 {strides = array<i32>} : memref<64x128xf32, #tpu.memory_space<vmem>>, vector<64x128xf32>,
    return
  }
  func.func @transform_0(%arg0: i32) -> (i32, i32) {
    %c0_i32 = arith.constant 0 : i32
    %c0_i32_0 = arith.constant 0 : i32
    %c0_i32_1 = arith.constant 0 : i32
    return %c0_i32, %c0_i32_0 : i32, i32
  }
  func.func @transform_1(%arg0: i32) -> (i32, i32) {
    %c0_i32 = arith.constant 0 : i32
    %c0_i32_0 = arith.constant 0 : i32
    %c0_i32_1 = arith.constant 0 : i32
    return %c0_i32, %c0_i32_0 : i32, i32
  }
  func.func @transform_2(%arg0: i32) -> (i32, i32) {
    %c0_i32 = arith.constant 0 : i32
    %c0_i32_0 = arith.constant 0 : i32
    return %c0_i32, %arg0 : i32, i32
  }
  func.func @transform_3(%arg0: i32) -> (i32, i32) {
    %c0_i32 = arith.constant 0 : i32
    %c0_i32_0 = arith.constant 0 : i32
    return %c0_i32, %arg0 : i32, i32
  }
}

</mosaic_0001>

<bundles_post_ra>
// kernel: metablock_forward.1
= control target key start
LH: loop header
LB: loop body
LE: loop exit
PB: predicated region body
PF: predicated region fallthrough
CT: control target
= control target key end

     0   :  { %8 = vsyncpa [#allocation4], 0  ;;  %s820_s0 = inlined_call_operand.vmem [shape: f32[64,1], index: 0, kind: input, shape index: {}]   ;;  %s821_s1 = inlined_call_operand.vmem [shape: f32[64,1], index: 1, kind: input, shape index: {}]   ;;  %s822_s2 = inlined_call_operand.vmem [shape: f32[64,256], index: 2, kind: input, shape index: {}]   ;;  %s823_s3 = inlined_call_operand.hbm [shape: f32[64,256], index: 3, kind: output, shape index: {}]  }
   0x1   :  { %10 = vsyncpa [#allocation4 + $0x1], 0  ;;  %s657_s12 = smov 0   ;;  %s659_s13 = smov 0  }
   0x2   :  { %s661_s14 = smov 0   ;;  %s663_s15 = smov 0  }
   0x3 LB: > { %s480_s16 = sadd.s32 4294967295, %s630_s15   ;;  %s481_s17 = sadd.s32 4294967294, %s630_s15   ;;  %s630_s15 = sphi %s663_s15, %s829_s15   ;;  %s626_s14 = sphi %s661_s14, %s828_s14   ;;  %s622_s13 = sphi %s659_s13, %s827_s13   ;;  %s618_s12 = sphi %s657_s12, %s826_s12  }
   0x4   : > { %s680_s18 = sadd.s32 1, %s630_s15   ;;  %s65_s19 = sadd.s32 1, %s626_s14 }
   0x5   : > { %s62_s20 = ssub.s32 %s630_s15, %s680_s18  ;;  %p72_p0 = scmp.ne.s32.totalorder %s626_s14, %s622_s13 }
   0x6   : > { %p63_p1 = scmp.eq.s32.totalorder %s62_s20, 0  ;;  %p73_p2 = scmp.eq.s32.totalorder %s630_s15, 0 }
   0x7   : > { %p102_p3 = scmp.eq.s32.totalorder %s480_s16, 1  ;;  %p107_p4 = scmp.ne.s32.totalorder %s622_s13, %s618_s12 }
   0x8   : > { %s693_s21 = scalar_select %p63_p1, %s626_s14, %s65_s19  }
   0x9   : > { %p74_p5 = por %p73_p2, %p72_p0  ;;  %p695_p6 = por %p102_p3, %p72_p0 }
   0xa   : > { %p108_p7 = scmp.eq.s32.totalorder %s481_s17, 1  ;;  %p483_p9 = scmp.ge.s32.totalorder %s630_s15, 2 }
   0xc   : > { %p699_p8 = por %p108_p7, %p107_p4  ;;  %130 = sbr.rel (%p483_p9) target bundleno = 25 (0x19), region = 24 }
  0x11   : > { %133 = sbr.rel (!%p74_p5) target bundleno = 25 (0x19), region = 28  ;;  %s135_s24 = sand.u32 (%p74_p5), 1, %s626_s14  }
  0x12   : > { %s485_s25 = sshll.u32 (%p74_p5), %s630_s15, 3  ;;  %s484_s26 = sshll.u32 (%p74_p5), %s135_s24, 6 }
  0x13   : > { %s139_s29 = scalar_lea.vmem (%p74_p5), %s822_s2, %s485_s25  ;;  %s137_s30 = scalar_lea.vmem (%p74_p5), [#allocation2], %s484_s26 }
  0x14   : > { %v182_v0 = vld [vmem:[%s139_s29] sm:$0xff] (%p74_p5)  ;;  %v184_v1 = vld [vmem:[%s139_s29 + $0x10] sm:$0xff] (%p74_p5) }
  0x15   : > { %v186_v2 = vld [vmem:[%s139_s29 + $0x20] sm:$0xff] (%p74_p5)  ;;  %183 = vst [vmem:[%s137_s30] sm:$0xff] (%p74_p5), %v182_v0  ;;  %185 = vst [vmem:[%s137_s30 + $0x8] sm:$0xff] (%p74_p5), %v184_v1  ;;  %v188_v3 = vld [vmem:[%s139_s29 + $0x30] sm:$0xff] (%p74_p5) }
  0x16   : > { %187 = vst [vmem:[%s137_s30 + $0x10] sm:$0xff] %v186_v2  ;;  %v190_v4 = vld [vmem:[%s139_s29 + $0x40] sm:$0xff]  ;;  %v192_v5 = vld [vmem:[%s139_s29 + $0x50] sm:$0xff]  ;;  %189 = vst [vmem:[%s137_s30 + $0x18] sm:$0xff] %v188_v3 }
  0x17   : > { %191 = vst [vmem:[%s137_s30 + $0x20] sm:$0xff] %v190_v4  ;;  %193 = vst [vmem:[%s137_s30 + $0x28] sm:$0xff] %v192_v5  ;;  %v194_v6 = vld [vmem:[%s139_s29 + $0x60] sm:$0xff]  ;;  %v196_v7 = vld [vmem:[%s139_s29 + $0x70] sm:$0xff] }
  0x18   : > { %195 = vst [vmem:[%s137_s30 + $0x30] sm:$0xff] %v194_v6  ;;  %197 = vst [vmem:[%s137_s30 + $0x38] sm:$0xff] %v196_v7 }
  0x19 PF: > { %p486_p10 = scmp.ge.s32.totalorder %s630_s15, 1  ;;  %p202_p11 = scmp.lt.s32.totalorder %s630_s15, 3 }
  0x1b   : > { %p203_p12 = pnand %p486_p10, %p202_p11 }
  0x1c   : > { %s209_s27 = sand.u32 (!%p203_p12), 1, %s622_s13   ;;  %s490_s5 = sshll.u32 (!%p203_p12), %s480_s16, 7 }
  0x1d   : > { %206 = sbr.rel (%p203_p12) target bundleno = 226 (0xe2), region = 66  ;;  %s764_s28 = sshll.u32 (!%p203_p12), %s209_s27, 6 }
  0x1e   : > { %s211_s29 = scalar_lea.vmem (!%p203_p12), [#allocation2], %s764_s28  ;;  %s231_s30 = scalar_lea.vmem (!%p203_p12), [#allocation3], %s764_s28 }
  0x1f   : > { %s413_s4 = sshll.u32 (!%p203_p12), %s231_s30, 4  ;;  %s775_s8 = scalar_lea.hbm (!%p203_p12), %s823_s3, %s490_s5  ;;  %s770_s4 = int_to_ptr.vmem [resolvable:$true] %s413_s4 }
  0x20   : > { %s779_s16 = scalar_lea.sflag (!%p203_p12), [#allocation4], %s209_s27  ;;  %s570_s9 = scalar_lea.vmem (!%p203_p12), %s770_s4, 1024 }
  0x21   : > { %p571_p13 = scmp.ne.s32.totalorder (!%p203_p12), %s770_s4, %s570_s9  ;;  %s633_s10 = smov (!%p203_p12), [#allocation3]  }
  0x22   : > { %v242_v8 = vld [vmem:[%s820_s0 + $0x10] sm:$0xff]  ;;  %v240_v9 = vld [vmem:[%s820_s0] sm:$0xff]  ;;  %v632_v10 = vmov 0   ;;  %v243_v11 = vld [vmem:[%s820_s0 + $0x18] sm:$0xff]  ;;  %s574_s11 = sshll.u32 %s633_s10, 4  ;;  %s575_s11 = int_to_ptr.vmem [resolvable:$false] %s574_s11 }
  0x23   : > { %537 = vset.pattern.permute.xlu1 %v632_v10  ;;  %536 = vset.pattern.permute.xlu0 %v632_v10  ;;  %v241_v12 = vld [vmem:[%s820_s0 + $0x8] sm:$0xff]  ;;  %v244_v14 = vld [vmem:[%s820_s0 + $0x20] sm:$0xff]  ;;  %v247_v15 = vld [vmem:[%s820_s0 + $0x38] sm:$0xff]  ;;  %p572_p0 = pnand %p571_p13, %p695_p6  ;;  %s576_s17 = scalar_lea.vmem %s575_s11, 2048 }
  0x24   : > { %260 = vperm.xlu1 %537, %v242_v8   ;;  %250 = vperm.xlu0 %536, %v240_v9   ;;  %v245_v13 = vld [vmem:[%s820_s0 + $0x28] sm:$0xff]  ;;  %v246_v16 = vld [vmem:[%s820_s0 + $0x30] sm:$0xff]  ;;  %v304_v18 = vld [vmem:[%s821_s1] sm:$0xff]  ;;  %p577_p2 = scmp.lt.s32.totalorder %s770_s4, %s575_s11  ;;  %p578_p3 = scmp.lt.s32.totalorder %s576_s17, %s570_s9 }
  0x25   : > { %v305_v17 = vld [vmem:[%s821_s1 + $0x8] sm:$0xff]  ;;  %v307_v19 = vld [vmem:[%s821_s1 + $0x18] sm:$0xff]  ;;  %v306_v20 = vld [vmem:[%s821_s1 + $0x10] sm:$0xff]  ;;  %p573_p1 = pneg %p572_p0 }
  0x26   : > { %v309_v21 = vld [vmem:[%s821_s1 + $0x28] sm:$0xff]  ;;  %v308_v22 = vld [vmem:[%s821_s1 + $0x20] sm:$0xff]  ;;  %v311_v23 = vld [vmem:[%s821_s1 + $0x38] sm:$0xff]  ;;  %p579_p4 = por %p578_p3, %p577_p2 }
  0x27   : > { %v310_v24 = vld [vmem:[%s821_s1 + $0x30] sm:$0xff]  ;;  %v232_v25 = vld [vmem:[%s211_s29] sm:$0xff]  ;;  %v235_v31 = vld [vmem:[%s211_s29 + $0x18] sm:$0xff] }
  0x28   : > { %265 = vperm.xlu1 %537, %v243_v11   ;;  %255 = vperm.xlu0 %536, %v241_v12   ;;  %v234_v26 = vld [vmem:[%s211_s29 + $0x10] sm:$0xff]  ;;  %v233_v32 = vld [vmem:[%s211_s29 + $0x8] sm:$0xff]  ;;  %v236_v38 = vld [vmem:[%s211_s29 + $0x20] sm:$0xff]  ;;  %p580_p5 = pnand %p579_p4, %p573_p1 }
  0x29   : > { %v237_v37 = vld [vmem:[%s211_s29 + $0x28] sm:$0xff]  ;;  %v239_v43 = vld [vmem:[%s211_s29 + $0x38] sm:$0xff]  ;;  %v238_v44 = vld [vmem:[%s211_s29 + $0x30] sm:$0xff] }
  0x2c   : > { %275 = vperm.xlu1 %537, %v245_v13   ;;  %270 = vperm.xlu0 %536, %v244_v14  }
  0x30   : > { %285 = vperm.xlu1 %537, %v247_v15   ;;  %280 = vperm.xlu0 %536, %v246_v16  }
  0x34   : > { %319 = vperm.xlu1 %537, %v305_v17   ;;  %314 = vperm.xlu0 %536, %v304_v18  }
  0x38   : > { %329 = vperm.xlu1 %537, %v307_v19   ;;  %324 = vperm.xlu0 %536, %v306_v20  }
  0x3c   : > { %339 = vperm.xlu1 %537, %v309_v21   ;;  %334 = vperm.xlu0 %536, %v308_v22  }
  0x40   : > { %349 = vperm.xlu1 %537, %v311_v23   ;;  %344 = vperm.xlu0 %536, %v310_v24  }
  0x9f   : > { %v261_v27 = vpop.permute.xlu1 %260  ;;  %v251_v28 = vpop.permute.xlu0 %250 }
  0xa0   : > { %v288_v29 = vmul.f32 %v251_v28, %v232_v25  ;;  %v290_v30 = vmul.f32 %v261_v27, %v234_v26 }
  0xa2   : > { %538 = vtanh.f32 %v288_v29 }
  0xa3   : > { %v266_v33 = vpop.permute.xlu1 %265  ;;  %v256_v34 = vpop.permute.xlu0 %255  ;;  %540 = vtanh.f32 %v290_v30 }
  0xa4   : > { %v291_v35 = vmul.f32 %v266_v33, %v235_v31  ;;  %v289_v36 = vmul.f32 %v256_v34, %v233_v32 }
  0xa6   : > { %542 = vtanh.f32 %v291_v35 }
  0xa7   : > { %544 = vtanh.f32 %v289_v36  ;;  %v276_v39 = vpop.permute.xlu1 %275  ;;  %v271_v40 = vpop.permute.xlu0 %270 }
  0xa8   : > { %v293_v41 = vmul.f32 %v276_v39, %v237_v37  ;;  %v292_v42 = vmul.f32 %v271_v40, %v236_v38 }
  0xaa   : > { %546 = vtanh.f32 %v293_v41 }
  0xab   : > { %548 = vtanh.f32 %v292_v42  ;;  %v286_v45 = vpop.permute.xlu1 %285  ;;  %v281_v46 = vpop.permute.xlu0 %280 }
  0xac   : > { %v295_v47 = vmul.f32 %v286_v45, %v239_v43  ;;  %v294_v48 = vmul.f32 %v281_v46, %v238_v44 }
  0xae   : > { %550 = vtanh.f32 %v295_v47 }
  0xaf   : > { %552 = vtanh.f32 %v294_v48  ;;  %v320_v49 = vpop.permute.xlu1 %319  ;;  %v315_v50 = vpop.permute.xlu0 %314 }
  0xb0   : > { %v539_v51 = vpop.eup %538 }
  0xb1   : > { %v352_v52 = vadd.f32 %v539_v51, %v315_v50  ;;  %v541_v53 = vpop.eup %540 }
  0xb3   : > { %v543_v54 = vpop.eup %542  ;;  %v360_v55 = vmul.f32 0.5, %v352_v52  ;;  %v330_v56 = vpop.permute.xlu1 %329 }
  0xb4   : > { %v325_v57 = vpop.permute.xlu0 %324  ;;  %v545_v58 = vpop.eup %544  ;;  %v355_v59 = vadd.f32 %v543_v54, %v330_v56 }
  0xb5   : > { %v354_v60 = vadd.f32 %v541_v53, %v325_v57  ;;  %v353_v61 = vadd.f32 %v545_v58, %v320_v49  ;;  %554 = vtanh.f32 %v360_v55 }
  0xb6   : > { %v363_v62 = vmul.f32 0.5, %v355_v59 }
  0xb7   : > { %v362_v63 = vmul.f32 0.5, %v354_v60  ;;  %v547_v0 = vpop.eup %546  ;;  %v361_v1 = vmul.f32 0.5, %v353_v61  ;;  %v340_v2 = vpop.permute.xlu1 %339 }
  0xb8   : > { %v335_v3 = vpop.permute.xlu0 %334  ;;  %v549_v4 = vpop.eup %548  ;;  %556 = vtanh.f32 %v363_v62  ;;  %v357_v5 = vadd.f32 %v547_v0, %v340_v2 }
  0xb9   : > { %558 = vtanh.f32 %v361_v1  ;;  %v356_v6 = vadd.f32 %v549_v4, %v335_v3 }
  0xba   : > { %560 = vtanh.f32 %v362_v63  ;;  %v365_v7 = vmul.f32 0.5, %v357_v5 }
  0xbb   : > { %v551_v8 = vpop.eup %550  ;;  %v364_v9 = vmul.f32 0.5, %v356_v6  ;;  %v350_v10 = vpop.permute.xlu1 %349 }
  0xbc   : > { %v345_v11 = vpop.permute.xlu0 %344  ;;  %v553_v12 = vpop.eup %552  ;;  %562 = vtanh.f32 %v365_v7  ;;  %v359_v13 = vadd.f32 %v551_v8, %v350_v10 }
  0xbd   : > { %564 = vtanh.f32 %v364_v9  ;;  %v358_v14 = vadd.f32 %v553_v12, %v345_v11 }
  0xbe   : > { %v367_v15 = vmul.f32 0.5, %v359_v13 }
  0xbf   : > { %v366_v16 = vmul.f32 0.5, %v358_v14 }
  0xc0   : > { %566 = vtanh.f32 %v367_v15 }
  0xc1   : > { %568 = vtanh.f32 %v366_v16 }
  0xc2   : > { %v555_v17 = vpop.eup %554 }
  0xc3   : > { %v376_v18 = vmul.f32 0.5, %v555_v17 }
  0xc5   : > { %v557_v19 = vpop.eup %556  ;;  %v384_v20 = vadd.f32 0.5, %v376_v18 }
  0xc6   : > { %v559_v21 = vpop.eup %558  ;;  %v379_v22 = vmul.f32 0.5, %v557_v19 }
  0xc7   : > { %v561_v23 = vpop.eup %560  ;;  %v377_v24 = vmul.f32 0.5, %v559_v21  ;;  %392 = vst [vmem:[%s231_s30] sm:$0xff] %v384_v20 }
  0xc8   : > { %v387_v25 = vadd.f32 0.5, %v379_v22  ;;  %v378_v26 = vmul.f32 0.5, %v561_v23 }
  0xc9   : > { %v563_v27 = vpop.eup %562  ;;  %v385_v28 = vadd.f32 0.5, %v377_v24 }
  0xca   : > { %v565_v29 = vpop.eup %564  ;;  %395 = vst [vmem:[%s231_s30 + $0x18] sm:$0xff] %v387_v25  ;;  %v386_v30 = vadd.f32 0.5, %v378_v26  ;;  %v381_v31 = vmul.f32 0.5, %v563_v27 }
  0xcb   : > { %393 = vst [vmem:[%s231_s30 + $0x8] sm:$0xff] %v385_v28  ;;  %v380_v32 = vmul.f32 0.5, %v565_v29 }
  0xcc   : > { %394 = vst [vmem:[%s231_s30 + $0x10] sm:$0xff] %v386_v30  ;;  %v389_v33 = vadd.f32 0.5, %v381_v31 }
  0xcd   : > { %v567_v34 = vpop.eup %566  ;;  %v388_v35 = vadd.f32 0.5, %v380_v32 }
  0xce   : > { %v569_v36 = vpop.eup %568  ;;  %397 = vst [vmem:[%s231_s30 + $0x28] sm:$0xff] %v389_v33  ;;  %v383_v37 = vmul.f32 0.5, %v567_v34 }
  0xcf   : > { %396 = vst [vmem:[%s231_s30 + $0x20] sm:$0xff] %v388_v35  ;;  %v382_v38 = vmul.f32 0.5, %v569_v36 }
  0xd0   : > { %v391_v39 = vadd.f32 0.5, %v383_v37 }
  0xd1   : > { %v390_v40 = vadd.f32 0.5, %v382_v38 }
  0xd2   : > { %399 = vst [vmem:[%s231_s30 + $0x38] sm:$0xff] %v391_v39 }
  0xd3   : > { %398 = vst [vmem:[%s231_s30 + $0x30] sm:$0xff] %v390_v40 }
  0xd4   : > { %583 = shalt.err (!%p580_p5)
}
  0xd5   : > { %s584_s19 = scalar_lea.hbm %s775_s8, 1024  ;;  %s588_s25 = scalar_lea.hbm %s823_s3, 2048 }
  0xd6   : > { %p585_p7 = scmp.ne.s32.totalorder %s775_s8, %s584_s19  ;;  %p589_p12 = scmp.lt.s32.totalorder %s775_s8, %s823_s3 }
  0xd7   : > { %p590_p13 = scmp.lt.s32.totalorder %s588_s25, %s584_s19 }
  0xd8   : > { %p586_p10 = pnand %p585_p7, %p695_p6 }
  0xd9   : > { %p591_p0 = por %p590_p13, %p589_p12 }
  0xda   : > { %p587_p11 = pneg %p586_p10 }
  0xdc   : > { %p592_p1 = pnand %p591_p0, %p587_p11 }
  0xde   : > { %595 = shalt.err (!%p592_p1)
}
  0xdf   : > { %s634_s28 = smov 128   ;;  %s635_s29 = smov 256  }
  0xe0   : > { %s636_s30 = smov 8  }
  0xe1   : > { %493 = dma.vmem_to_hbm [thread:$0]  (%p695_p6), %s770_s4, 1024, %s775_s8, %s779_s16, %s634_s28, %s635_s29, %s636_s30  }
  0xe2 PF: > { %s428_s5 = sand.u32 1, %s618_s12   ;;  %p496_p2 = pnand %p483_p9, %p699_p8 }
  0xe3   : > { %s429_s6 = scalar_lea.sflag [#allocation4], %s428_s5 }
  0xe4   : > { %p497_p3 = pneg %p496_p2 }
  0xe6   : > { %613 = dma.done.wait (%p497_p3), %s429_s6, 1024  }
  0xe7   : > { %615 = vsyncadd (%p497_p3), %s429_s6, 4294966272  ;;  %p13_p4 = scmp.ge.s32.totalorder %s680_s18, 4   ;;  %s826_s12 = smov %s622_s13 }
  0xe8   : > { %s827_s13 = smov %s626_s14  ;;  %s828_s14 = smov %s693_s21 }
  0xe9   : > { %s829_s15 = smov %s680_s18  ;;  %15 = sbr.rel (!%p13_p4) target bundleno = 3 (0x3), region = 110 }
  0xee   :  { %434 = vsyncpa [#allocation4], 1 }
  0xef   :  { %436 = vsyncpa [#allocation4 + $0x1], 1 }

</bundles_post_ra>
